<compile_context>
chip_gen: v6e
topology: v6e:2x2x1
jax: 0.10.0
libtpu: 0.0.40
codegen_flags: <defaults>
</compile_context>

<pallas_src>
import functools
import math

import numpy as np

import jax
import jax.numpy as jnp
from jax.experimental import pallas as pl
from jax.experimental.pallas import tpu as pltpu

LANE = 128


# ----------------------------- helpers ---------------------------------------
def _largest_divisor_leq(n, cap):
    cap = max(1, min(n, cap))
    for d in range(cap, 0, -1):
        if n % d == 0:
            return d
    return 1


@functools.lru_cache(maxsize=16)
def _dft_constants(seq_len, hidden, hidden_pad, tile_h, dtype_name):
    """Cached DFT constant matrices, laid out for the fused kernel."""
    dtype = jnp.dtype(dtype_name)

    def cos_sin(n):
        # int64 outer product + mod keeps j*k exact and the f64 angles in
        # [0, 2*pi), so cos/sin stay accurate even for very long sequences.
        k = np.arange(n, dtype=np.int64)
        ang = (2.0 * math.pi / n) * (np.outer(k, k) % n).astype(np.float64)
        return np.cos(ang), np.sin(ang)

    cs, ss = cos_sin(seq_len)
    ch, sh = cos_sin(hidden)
    if hidden_pad != hidden:
        pad = ((0, 0), (0, hidden_pad - hidden))
        ch = np.pad(ch, pad)   # zero output columns -> sliced off by caller
        sh = np.pad(sh, pad)

    # Second-stage LHS  [C_S | -S_S]   (out = C_S @ xr - S_S @ xi).
    cs_negss = np.concatenate([cs, -ss], axis=1)                    # [S, 2S]

    # First-stage RHS with per-tile layout [C_H_tile | S_H_tile], so one
    # (hidden, 2*tile_h) block at block index h yields both halves at once.
    n_h = hidden_pad // tile_h
    chsh = np.stack([ch.reshape(hidden, n_h, tile_h),
                     sh.reshape(hidden, n_h, tile_h)], axis=2)
    chsh = chsh.reshape(hidden, 2 * hidden_pad)                     # [H, 2*Hp]

    return (jnp.asarray(cs_negss, dtype=dtype),
            jnp.asarray(chsh, dtype=dtype))


# ----------------------------- Pallas kernel ---------------------------------
def _fourier_kernel(x_ref, csn_ref, chsh_ref, out_ref, *, compute_dtype):
    tb, s, h = x_ref.shape
    th = chsh_ref.shape[1] // 2

    # Stage 1 (FFT along the hidden dim): one MXU matmul with the RHS halves
    # [C_H | S_H] concatenated on lanes; M = tb*s fills the MXU for tiny S.
    x = x_ref[...].astype(compute_dtype).reshape(tb * s, h)
    st1 = jnp.dot(x, chsh_ref[...], preferred_element_type=jnp.float32)
    st1 = st1.reshape(tb, s, 2 * th)                      # [tb, S, xr|xi]

    csn = csn_ref[...]                                    # [S, 2S] = [C_S|-S_S]
    for b in range(tb):                                   # tb is a small static int
        xr = st1[b, :, :th].astype(compute_dtype)         # [S, th]
        xi = st1[b, :, th:].astype(compute_dtype)         # [S, th]
        # Stage 2 (FFT along the sequence dim, real part): one MXU matmul of
        # [C_S | -S_S] against [xr ; xi] stacked on sublanes.
        xrxi = jnp.concatenate([xr, xi], axis=0)          # [2S, th]
        out_b = jnp.dot(csn, xrxi, preferred_element_type=jnp.float32)
        out_ref[b] = out_b.astype(out_ref.dtype)


# ----------------------------- wrapper ----------------------------------------
def fourier_fft_forward(hidden_states, *, compute_dtype=jnp.bfloat16):
    """Pallas-backed Real(FFT(FFT(x, dim=-1), dim=-2)) for real x[B, S, H]."""
    B, S, H = hidden_states.shape

    # Lane-dense output: pad the output hidden dim to a multiple of 128.
    Hp = max(LANE, ((H + LANE - 1) // LANE) * LANE)

    # Output-hidden tile: bounds per-step VMEM and keeps the matmul N dim at
    # 256+ where possible (256x256 MXU on v6e/v7x).
    if Hp <= 512:
        TH = Hp
    elif Hp % 512 == 0:
        TH = 512
    elif Hp % 256 == 0:
        TH = 256
    else:
        TH = 128
    n_h = Hp // TH

    # Block several batches per grid step when the per-batch slab is tiny so
    # the first-stage matmul fills the MXU M dimension.
    TB = _largest_divisor_leq(B, min(16, max(1, 512 // max(S, 1))))
    n_b = B // TB

    cs_negss, chsh = _dft_constants(S, H, Hp, TH, jnp.dtype(compute_dtype).name)

    # Constant-index DFT blocks: DMA'd once, single-buffered to halve their
    # VMEM footprint.
    csn_spec = pl.BlockSpec((S, 2 * S), lambda b, h: (0, 0),
                            pipeline_mode=pl.Buffered(1))
    if n_h == 1:
        chsh_spec = pl.BlockSpec((H, 2 * TH), lambda b, h: (0, 0),
                                 pipeline_mode=pl.Buffered(1))
    else:
        chsh_spec = pl.BlockSpec((H, 2 * TH), lambda b, h: (0, h))

    out = pl.pallas_call(
        functools.partial(_fourier_kernel, compute_dtype=compute_dtype),
        out_shape=jax.ShapeDtypeStruct((B, S, Hp), hidden_states.dtype),
        grid_spec=pl.GridSpec(
            # h innermost: the x slab stays VMEM-resident across hidden tiles.
            grid=(n_b, n_h),
            in_specs=[
                pl.BlockSpec((TB, S, H), lambda b, h: (b, 0, 0)),   # x slab
                csn_spec,                                            # [C_S|-S_S]
                chsh_spec,                                           # [C_H|S_H] tile
            ],
            out_specs=pl.BlockSpec((TB, S, TH), lambda b, h: (b, 0, h)),
        ),
        compiler_params=pltpu.CompilerParams(
            dimension_semantics=("parallel", "parallel"),
            vmem_limit_bytes=64 * 1024 * 1024,
        ),
    )(hidden_states, cs_negss, chsh)

    if Hp != H:
        # TODO(synk): fuse this slice into the consumer (or keep the padded
        # layout downstream) to avoid an extra full-output HBM round trip for
        # non-multiple-of-128 hidden sizes.
        out = out[..., :H]
    return out


# ----------------------------- reference (plain JAX) --------------------------
def reference_forward(hidden_states):
    return jnp.real(jnp.fft.fft(jnp.fft.fft(hidden_states, axis=-1), axis=-2))


# ----------------------------- main -------------------------------------------
if __name__ == "__main__":
    key = jax.random.PRNGKey(0)
    B, S, H = 2, 8, 32
    hidden_states = jax.random.normal(key, (B, S, H), dtype=jnp.float32)

    ref = reference_forward(hidden_states)

    # Default fast path: bf16 MXU operands / f32 accumulation.  Tolerance is
    # scaled for bf16 operand rounding (error grows with sqrt(S*H)).
    out = jax.block_until_ready(fourier_fft_forward(hidden_states))
    assert out.shape == (B, S, H)
    scale = float(jnp.max(jnp.abs(ref)))
    max_err = float(jnp.max(jnp.abs(out - ref)))
    assert max_err <= 0.05 * scale + 0.05, f"bf16-path mismatch vs jnp.fft: {max_err}"

    # Full-precision path: tight numerical check of the kernel math.
    out_f32 = jax.block_until_ready(
        fourier_fft_forward(hidden_states, compute_dtype=jnp.float32))
    assert jnp.allclose(out_f32, ref, atol=1e-3, rtol=1e-3), "f32-path mismatch vs jnp.fft"

    print("KERNEL_OK")
</pallas_src>

<mosaic_0001>
module attributes {stable_mosaic.version = 11 : i64} {
  func.func @_fourier_kernel(%arg0: i32, %arg1: i32, %arg2: memref<2x8x32xf32, #tpu.memory_space<vmem>>, %arg3: memref<8x16xbf16, #tpu.memory_space<vmem>>, %arg4: memref<32x256xbf16, #tpu.memory_space<vmem>>, %arg5: memref<2x8x128xf32, #tpu.memory_space<vmem>>) attributes {dimension_semantics = [#tpu.dimension_semantics<parallel>, #tpu.dimension_semantics<parallel>], iteration_bounds = array<i64: 1, 1>, scalar_prefetch = 0 : i64, scratch_operands = 0 : i64, tpu.core_type = #tpu.core_type<tc>, window_params = [{transform_indices = @transform_0, window_bounds = array<i64: 2, 8, 32>}, {pipeline_mode = #tpu.pipeline_mode<synchronous>, transform_indices = @transform_1, window_bounds = array<i64: 8, 16>}, {pipeline_mode = #tpu.pipeline_mode<synchronous>, transform_indices = @transform_2, window_bounds = array<i64: 32, 256>}, {transform_indices = @transform_3, window_bounds = array<i64: 2, 8, 128>}]} {
    %c0 = arith.constant 0 : index
    %c0_0 = arith.constant 0 : index
    %c0_1 = arith.constant 0 : index
    %0 = vector.load %arg2[%c0, %c0_0, %c0_1] : memref<2x8x32xf32, #tpu.memory_space<vmem>>, vector<2x8x32xf32>
    %1 = arith.truncf %0 : vector<2x8x32xf32> to vector<2x8x32xbf16>
    %2 = vector.shape_cast %1 : vector<2x8x32xbf16> to vector<16x32xbf16>
    %c0_2 = arith.constant 0 : index
    %c0_3 = arith.constant 0 : index
    %3 = vector.load %arg4[%c0_2, %c0_3] : memref<32x256xbf16, #tpu.memory_space<vmem>>, vector<32x256xbf16>
    %cst = arith.constant dense<0.000000e+00> : vector<16x256xf32>
    %4 = tpu.matmul %2, %3, %cst {dimension_numbers = #tpu.dot_dimension_numbers<[1], [0], [0], [1], [0, 0, 1, 1], [], []>} : vector<16x32xbf16>, vector<32x256xbf16>, vector<16x256xf32> -> vector<16x256xf32>
    %5 = vector.shape_cast %4 : vector<16x256xf32> to vector<2x8x256xf32>
    %c0_4 = arith.constant 0 : index
    %c0_5 = arith.constant 0 : index
    %6 = vector.load %arg3[%c0_4, %c0_5] : memref<8x16xbf16, #tpu.memory_space<vmem>>, vector<8x16xbf16>
    %7 = vector.extract_strided_slice %5 {offsets = [0, 0, 0], sizes = [1, 8, 128], strides = [1, 1, 1]} : vector<2x8x256xf32> to vector<1x8x128xf32>
    %8 = vector.shape_cast %7 : vector<1x8x128xf32> to vector<8x128xf32>
    %9 = arith.truncf %8 : vector<8x128xf32> to vector<8x128xbf16>
    %10 = vector.extract_strided_slice %5 {offsets = [0, 0, 128], sizes = [1, 8, 128], strides = [1, 1, 1]} : vector<2x8x256xf32> to vector<1x8x128xf32>
    %11 = vector.shape_cast %10 : vector<1x8x128xf32> to vector<8x128xf32>
    %12 = arith.truncf %11 : vector<8x128xf32> to vector<8x128xbf16>
    %13 = tpu.concatenate %9, %12 in 0 : vector<8x128xbf16>, vector<8x128xbf16> -> vector<16x128xbf16>
    %cst_6 = arith.constant dense<0.000000e+00> : vector<8x128xf32>
    %14 = tpu.matmul %6, %13, %cst_6 {dimension_numbers = #tpu.dot_dimension_numbers<[1], [0], [0], [1], [0, 0, 1, 1], [], []>} : vector<8x16xbf16>, vector<16x128xbf16>, vector<8x128xf32> -> vector<8x128xf32>
    %c0_7 = arith.constant 0 : index
    %c0_8 = arith.constant 0 : index
    %c0_9 = arith.constant 0 : index
    %15 = vector.load %arg5[%c0_7, %c0_8, %c0_9] : memref<2x8x128xf32, #tpu.memory_space<vmem>>, vector<1x8x128xf32>
    %16 = vector.shape_cast %15 : vector<1x8x128xf32> to vector<8x128xf32>
    %17 = vector.shape_cast %14 : vector<8x128xf32> to vector<1x8x128xf32>
    tpu.vector_store %arg5[%c0_7, %c0_8, %c0_9], %17 {strides = array<i32>} : memref<2x8x128xf32, #tpu.memory_space<vmem>>, vector<1x8x128xf32>,
    %18 = vector.extract_strided_slice %5 {offsets = [1, 0, 0], sizes = [1, 8, 128], strides = [1, 1, 1]} : vector<2x8x256xf32> to vector<1x8x128xf32>
    %19 = vector.shape_cast %18 : vector<1x8x128xf32> to vector<8x128xf32>
    %20 = arith.truncf %19 : vector<8x128xf32> to vector<8x128xbf16>
    %21 = vector.extract_strided_slice %5 {offsets = [1, 0, 128], sizes = [1, 8, 128], strides = [1, 1, 1]} : vector<2x8x256xf32> to vector<1x8x128xf32>
    %22 = vector.shape_cast %21 : vector<1x8x128xf32> to vector<8x128xf32>
    %23 = arith.truncf %22 : vector<8x128xf32> to vector<8x128xbf16>
    %24 = tpu.concatenate %20, %23 in 0 : vector<8x128xbf16>, vector<8x128xbf16> -> vector<16x128xbf16>
    %cst_10 = arith.constant dense<0.000000e+00> : vector<8x128xf32>
    %25 = tpu.matmul %6, %24, %cst_10 {dimension_numbers = #tpu.dot_dimension_numbers<[1], [0], [0], [1], [0, 0, 1, 1], [], []>} : vector<8x16xbf16>, vector<16x128xbf16>, vector<8x128xf32> -> vector<8x128xf32>
    %c1 = arith.constant 1 : index
    %c0_11 = arith.constant 0 : index
    %c0_12 = arith.constant 0 : index
    %26 = vector.load %arg5[%c1, %c0_11, %c0_12] : memref<2x8x128xf32, #tpu.memory_space<vmem>>, vector<1x8x128xf32>
    %27 = vector.shape_cast %26 : vector<1x8x128xf32> to vector<8x128xf32>
    %28 = vector.shape_cast %25 : vector<8x128xf32> to vector<1x8x128xf32>
    tpu.vector_store %arg5[%c1, %c0_11, %c0_12], %28 {strides = array<i32>} : memref<2x8x128xf32, #tpu.memory_space<vmem>>, vector<1x8x128xf32>,
    return
  }
  func.func @transform_0(%arg0: i32, %arg1: i32) -> (i32, i32, i32) {
    %c0_i32 = arith.constant 0 : i32
    %c0_i32_0 = arith.constant 0 : i32
    %c0_i32_1 = arith.constant 0 : i32
    return %arg0, %c0_i32, %c0_i32_0 : i32, i32, i32
  }
  func.func @transform_1(%arg0: i32, %arg1: i32) -> (i32, i32) {
    %c0_i32 = arith.constant 0 : i32
    %c0_i32_0 = arith.constant 0 : i32
    %c0_i32_1 = arith.constant 0 : i32
    return %c0_i32, %c0_i32_0 : i32, i32
  }
  func.func @transform_2(%arg0: i32, %arg1: i32) -> (i32, i32) {
    %c0_i32 = arith.constant 0 : i32
    %c0_i32_0 = arith.constant 0 : i32
    %c0_i32_1 = arith.constant 0 : i32
    return %c0_i32, %c0_i32_0 : i32, i32
  }
  func.func @transform_3(%arg0: i32, %arg1: i32) -> (i32, i32, i32) {
    %c0_i32 = arith.constant 0 : i32
    %c0_i32_0 = arith.constant 0 : i32
    return %arg0, %c0_i32, %arg1 : i32, i32, i32
  }
}

</mosaic_0001>

<bundles_post_ra>
// kernel: tpu_custom_call.1
= control target key start
LH: loop header
LB: loop body
LE: loop exit
PB: predicated region body
PF: predicated region fallthrough
CT: control target
= control target key end

     0   :  { %8 = vsyncpa [#allocation3], 0  ;;  %s436_s0 = inlined_call_operand.hbm [shape: f32[2,8,32], index: 0, kind: input, shape index: {}]   ;;  %s437_s1 = inlined_call_operand.hbm [shape: bf16[8,16], index: 1, kind: input, shape index: {}]   ;;  %s438_s2 = inlined_call_operand.hbm [shape: bf16[32,256], index: 2, kind: input, shape index: {}]   ;;  %s439_s3 = inlined_call_operand.hbm [shape: f32[2,8,128], index: 3, kind: output, shape index: {}]  }
   0x1   :  { %9 = vsyncpa [#allocation6], 0 }
   0x2   :  { %10 = vsyncpa [#allocation4], 0  ;;  %s384_s12 = smov [#allocation5]   ;;  %s385_s14 = smov [#allocation2]  }
   0x3   :  { %s29_s13 = sshll.u32 %s384_s12, 4  ;;  %s16_s15 = sshll.u32 %s385_s14, 4  ;;  %s30_s13 = int_to_ptr.vmem [resolvable:$true] %s29_s13  ;;  %s17_s15 = int_to_ptr.vmem [resolvable:$true] %s16_s15 }
   0x4   :  { %s306_s16 = scalar_lea.vmem %s30_s13, 64  ;;  %p311_p1 = scmp.lt.s32.totalorder %s30_s13, %s30_s13 }
   0x5   :  { %p307_p0 = scmp.ne.s32.totalorder %s30_s13, %s306_s16  ;;  %p312_p2 = scmp.lt.s32.totalorder %s306_s16, %s306_s16 }
   0x7   :  { %p313_p3 = por %p312_p2, %p311_p1 }
   0x9   :  { %p314_p4 = pnand %p313_p3, %p307_p0 }
   0xb   :  { %317 = shalt.err (!%p314_p4)
}
   0xc   :  { %32 = dma.hbm_to_vmem [thread:$0]  %s437_s1, 64, %s30_s13, [#allocation6]  }
   0xd   :  { %s326_s19 = scalar_lea.vmem %s17_s15, 256  ;;  %p331_p6 = scmp.lt.s32.totalorder %s17_s15, %s17_s15 }
   0xe   :  { %p327_p5 = scmp.ne.s32.totalorder %s17_s15, %s326_s19  ;;  %p332_p7 = scmp.lt.s32.totalorder %s326_s19, %s326_s19 }
  0x10   :  { %p333_p8 = por %p332_p7, %p331_p6 }
  0x12   :  { %p334_p9 = pnand %p333_p8, %p327_p5 }
  0x14   :  { %337 = shalt.err (!%p334_p9)
}
  0x15   :  { %s386_s20 = smov 128   ;;  %s387_s21 = smov 8  }
  0x16   :  { %22 = dma.hbm_to_vmem [thread:$0]  %s436_s0, 256, %s17_s15, [#allocation3], %s386_s20, %s386_s20, %s387_s21  }
  0x17   :  { %s388_s24 = smov [#allocation7]  }
  0x18   :  { %s38_s25 = sshll.u32 %s388_s24, 4  ;;  %s39_s25 = int_to_ptr.vmem [resolvable:$true] %s38_s25 }
  0x19   :  { %s346_s1 = scalar_lea.vmem %s39_s25, 512  ;;  %p351_p11 = scmp.lt.s32.totalorder %s39_s25, %s39_s25 }
  0x1a   :  { %p347_p10 = scmp.ne.s32.totalorder %s39_s25, %s346_s1  ;;  %p352_p12 = scmp.lt.s32.totalorder %s346_s1, %s346_s1 }
  0x1c   :  { %p353_p13 = por %p352_p12, %p351_p11 }
  0x1e   :  { %p354_p0 = pnand %p353_p13, %p347_p10 }
  0x20   :  { %357 = shalt.err (!%p354_p0)
}
  0x21   :  { %44 = dma.hbm_to_vmem [thread:$0]  %s438_s2, 512, %s39_s25, [#allocation6], %s386_s20, %s386_s20, %s387_s21  }
  0x22   :  { %378 = dma.done.wait [#allocation3], 256  }
  0x23   :  { %379 = vsyncadd [#allocation3], 4294967040 }
  0x24   :  { %380 = dma.done.wait [#allocation6], 576  }
  0x25   :  { %381 = vsyncadd [#allocation6], 4294966720  ;;  %v389_v0 = vmov 0   ;;  %v292_v1 = vld [vmem:[#allocation7 + $0x14] ss:$8 sps:$4 sm:$0xff]   ;;  %v55_v5 = vld [vmem:[#allocation2] sm:$0xff] }
  0x26   :  { %124 = vmatprep.mubr.bf16.mxu0 %v389_v0  ;;  %v294_v2 = vld [vmem:[#allocation7 + $0x10] ss:$8 sps:$4 sm:$0xff]   ;;  %104 = vmatprep.subr.bf16.mxu0 %v292_v1  ;;  %v295_v3 = vld [vmem:[#allocation7 + $0x4] ss:$8 sps:$4 sm:$0xff]   ;;  %v297_v4 = vld [vmem:[#allocation7] ss:$8 sps:$4 sm:$0xff]  }
  0x27   :  { %105 = vmatpush1.bf16.msra.mxu0 %v294_v2  ;;  %v56_v6 = vld [vmem:[#allocation2 + $0x8] sm:$0xff]  ;;  %vm88_vm0 = vcmask 261120   ;;  %v390_v8 = vmov 0.0   ;;  %vm391_vm1 = vmmov 0   ;;  %vm140_vm2 = vcmask 1043456   ;;  %s392_s0 = smov [#allocation8]  }
  0x28   :  { %106 = vmatprep.subr.bf16.mxu0 %v295_v3  ;;  %v266_v7 = vpack.c.bf16 %v56_v6, %v55_v5  ;;  %271 = vmatprep.subr.bf16.mxu1 %v390_v8  ;;  %v135_v18 = vld [vmem:[#allocation5] sm:$0xf]  ;;  %vm145_vm3 = vcmask 130048   ;;  %s245_s2 = sshll.u32 %s392_s0, 4  ;;  %s246_s2 = int_to_ptr.vmem [resolvable:$true] %s245_s2 }
  0x29   :  { %273 = vmatprep.mubr.msk.bf16.mxu1 %vm391_vm1, %v390_v8  ;;  %s358_s28 = scalar_lea.vmem %s246_s2, 256  ;;  %p363_p2 = scmp.lt.s32.totalorder %s246_s2, %s246_s2 }
  0x2a   :  { %p359_p1 = scmp.ne.s32.totalorder %s246_s2, %s358_s28  ;;  %p364_p3 = scmp.lt.s32.totalorder %s358_s28, %s358_s28 }
  0x2b   :  { %107 = vmatpush1.bf16.msra.mxu0 %v297_v4 }
  0x2c   :  { %p365_p4 = por %p364_p3, %p363_p2 }
  0x2e   :  { %263 = vmatmul.mubr.msk.bf16.vlgmr.msra.gmra.mxu0 %vm88_vm0, %v266_v7  ;;  %p366_p5 = pnand %p365_p4, %p359_p1 }
  0xee   :  { %v126_v9 = vpop.f32.mrf.mxu0 }
  0xef   :  { %v136_v13 = vpack.c.bf16 %v126_v9, %v126_v9 }
  0xf0   :  { %v128_v10 = vpop.f32.mrf.mxu0 }
  0xf1   :  { %v137_v11 = vpack.c.bf16 %v128_v10, %v128_v10 }
  0xf2   :  { %v130_v12 = vpop.f32.mrf.mxu0 }
  0xf3   :  { %v139_v14 = vrot.slane %v137_v11, 4  ;;  %v190_v19 = vpack.c.bf16 %v130_v12, %v130_v12 }
  0xf4   :  { %v132_v15 = vpop.f32.mrf.mxu0 }
  0xf5   :  { %v191_v16 = vpack.c.bf16 %v132_v15, %v132_v15  ;;  %v143_v17 = vsel %vm140_vm2, %v136_v13, %v139_v14 }
  0xf6   :  { %272 = vmatpush3.bf16.msra.mxu1 %v143_v17 }
  0xf7   :  { %v193_v20 = vrot.slane %v191_v16, 4  ;;  %277 = vmatprep.subr.bf16.mxu1 %v390_v8 }
  0xf9   :  { %274 = vmatmul.mubr.msk.bf16.vlgmr.msra.gmra.mxu1 %vm145_vm3, %v135_v18  ;;  %v196_v21 = vsel %vm140_vm2, %v190_v19, %v193_v20 }
  0xfa   :  { %278 = vmatpush3.bf16.msra.mxu1 %v196_v21  ;;  %279 = vmatprep.mubr.msk.bf16.mxu1 %vm391_vm1, %v390_v8 }
 0x101   :  { %280 = vmatmul.mubr.msk.bf16.vlgmr.msra.gmra.mxu1 %vm145_vm3, %v135_v18 }
 0x1b9   :  { %v183_v22 = vpop.f32.mrf.mxu1 }
 0x1ba   :  { %189 = vst [vmem:[#allocation8] sm:$0xff] %v183_v22 }
 0x1bb   :  { %v275_v23 = vpop.f32.mrf.mxu1 }
 0x1bd   :  { %v186_v24 = vpop.f32.mrf.mxu1 }
 0x1bf   :  { %v276_v25 = vpop.f32.mrf.mxu1 }
 0x1c1   :  { %v232_v26 = vpop.f32.mrf.mxu1 }
 0x1c2   :  { %239 = vst [vmem:[#allocation8 + $0x8] sm:$0xff] %v232_v26 }
 0x1c3   :  { %v281_v27 = vpop.f32.mrf.mxu1 }
 0x1c4   :  { %369 = shalt.err (!%p366_p5)
}
 0x1c5   :  { %251 = dma.vmem_to_hbm [thread:$0]  %s246_s2, 256, %s439_s3, [#allocation4], %s386_s20, %s386_s20, %s387_s21   ;;  %v235_v28 = vpop.f32.mrf.mxu1 }
 0x1c7   :  { %v282_v29 = vpop.f32.mrf.mxu1 }
 0x1c8   :  { %382 = dma.done.wait [#allocation4], 256  }
 0x1c9   :  { %383 = vsyncadd [#allocation4], 4294967040 }
 0x1ca   :  { %255 = vsyncpa [#allocation3], 1 }
 0x1cb   :  { %256 = vsyncpa [#allocation6], 1 }
 0x1cc   :  { %257 = vsyncpa [#allocation4], 1 }

</bundles_post_ra>
